<compile_context>
chip_gen: v7x
topology: tpu7x:2x2x1
jax: 0.10.0
libtpu: 0.0.40
codegen_flags: <defaults>
</compile_context>

<pallas_src>
import functools

import jax
import jax.numpy as jnp
from jax.experimental import pallas as pl
from jax.experimental.pallas import tpu as pltpu


def _glu_kernel(x_ref, w_ref, b_ref, o_ref, *, n_batch, n_chan, use_mxu):
    # x_ref/o_ref: (Bb, C, T) tiles of the (B, C, H*W) tensor (spatial on lanes).
    # w_ref: (C, C) nn.Linear weight (out, in); b_ref: (C, 1) bias column.
    b_col = b_ref[...].astype(jnp.float32)                      # (C, 1)

    if use_mxu:
        w = w_ref[...]                                           # activation dtype -> MXU

        def per_row(bb):
            x_raw = x_ref[bb]                                    # (C, T)
            lin = jnp.dot(w, x_raw, preferred_element_type=jnp.float32) + b_col
            gate = jax.nn.sigmoid(x_raw.astype(jnp.float32))     # gate uses pre-linear x
            o_ref[bb] = (lin * gate).astype(o_ref.dtype)

        if n_batch <= 8:
            for bb in range(n_batch):                            # short static unroll
                per_row(bb)
        else:
            @pl.loop(0, n_batch)                                 # dynamic batch loop
            def _(bb):
                per_row(bb)
    else:
        # Tiny C: batched broadcast multiply-adds on the VPU.  VALU has plenty
        # of slack in a memory-bound kernel, so this is effectively free and
        # skips MXU push/pop latency for a ~C/256-utilized systolic array.
        w = w_ref[...].astype(jnp.float32)                       # (C, C)
        xf = x_ref[...].astype(jnp.float32)                      # (Bb, C, T), one upcast
        lin = jnp.broadcast_to(b_col[None], xf.shape)            # hoisted broadcast
        for c in range(n_chan):                                  # static unroll, C <= 8
            lin = lin + w[:, c:c + 1][None] * xf[:, c:c + 1, :]
        o_ref[...] = (lin * jax.nn.sigmoid(xf)).astype(o_ref.dtype)


def _choose_block(batch, chan, hw, itemsize, target_bytes):
    """Pick (Bb, t): ~target_bytes of activations per grid step; t % 128 == 0 or t == hw."""
    slab_bytes = chan * hw * itemsize                # one batch row, full spatial
    if slab_bytes >= target_bytes:
        # Tile the spatial axis.
        t = (target_bytes // (chan * itemsize)) // 128 * 128
        t = max(128, min(t, hw))
        if hw < 128:
            t = hw                                   # full extent (always legal)
        bb = 1
    else:
        # Full spatial per step; block several batch rows to fill the budget.
        t = hw
        bb = max(1, min(batch, target_bytes // max(slab_bytes, 1)))
    return bb, t


def glu_forward(x_nchw, weight, bias, *, target_block_bytes=2 << 20):
    """x_nchw: (B, C, H, W); weight: (C, C) as nn.Linear (out, in); bias: (C,)."""
    B, C, H, W = x_nchw.shape
    HW = H * W
    itemsize = x_nchw.dtype.itemsize

    # VPU/MXU crossover (roofline crossover is ~C=8-12 on v6e, lower on v5e).
    use_mxu = C > 8
    # MXU path: weight in the activation dtype so bf16 x bf16 hits the fast MXU
    # path and the resident weight takes half the VMEM.  VPU path stays f32.
    w_in = weight.astype(x_nchw.dtype) if use_mxu else weight.astype(jnp.float32)
    b_col = bias.astype(jnp.float32).reshape(C, 1)

    x_flat = x_nchw.reshape(B, C, HW)                # zero-cost view, no transpose

    Bb, t = _choose_block(B, C, HW, itemsize, target_block_bytes)
    n_b = pl.cdiv(B, Bb)
    n_hw = pl.cdiv(HW, t)

    # Keep >= 2 grid steps so both v7x TensorCores get work (harmless on v5e/v6e).
    if n_b * n_hw < 2:
        if B >= 2:
            Bb = (B + 1) // 2
            n_b = pl.cdiv(B, Bb)
        elif HW > 128:
            t = ((HW + 1) // 2 + 127) // 128 * 128
            n_hw = pl.cdiv(HW, t)

    # Grid-invariant weight/bias: single-buffer once the weight is big enough to
    # matter (halves its VMEM; most relevant on v7x's 64 MiB VMEM).
    w_bytes_one = C * C * w_in.dtype.itemsize
    if w_bytes_one >= (1 << 20):
        w_spec = pl.BlockSpec((C, C), lambda i, j: (0, 0), pipeline_mode=pl.Buffered(1))
        b_spec = pl.BlockSpec((C, 1), lambda i, j: (0, 0), pipeline_mode=pl.Buffered(1))
        w_bufs = 1
    else:
        w_spec = pl.BlockSpec((C, C), lambda i, j: (0, 0))
        b_spec = pl.BlockSpec((C, 1), lambda i, j: (0, 0))
        w_bufs = 2

    # Explicit VMEM budget: double-buffered in+out activation tiles, resident
    # weight, plus headroom for the kernel's f32 temporaries.
    block_bytes = Bb * C * t * itemsize
    f32_tmp = Bb * C * t * 4
    vmem_needed = 4 * block_bytes + w_bufs * w_bytes_one + 4 * f32_tmp + (2 << 20)
    vmem_limit = int(min(max(vmem_needed, 32 << 20), 100 << 20))

    kernel = functools.partial(_glu_kernel, n_batch=Bb, n_chan=C, use_mxu=use_mxu)

    out_flat = pl.pallas_call(
        kernel,
        out_shape=jax.ShapeDtypeStruct((B, C, HW), x_nchw.dtype),
        grid_spec=pltpu.PrefetchScalarGridSpec(
            num_scalar_prefetch=0,
            grid=(n_b, n_hw),
            in_specs=[
                pl.BlockSpec((Bb, C, t), lambda i, j: (i, 0, j)),
                w_spec,                               # resident weight
                b_spec,                               # resident bias
            ],
            out_specs=pl.BlockSpec((Bb, C, t), lambda i, j: (i, 0, j)),
        ),
        compiler_params=pltpu.CompilerParams(
            dimension_semantics=("parallel", "parallel"),
            vmem_limit_bytes=vmem_limit),
    )(x_flat, w_in, b_col)

    return out_flat.reshape(B, C, H, W)


def glu_reference(x_nchw, weight, bias):
    x_nhwc = jnp.transpose(x_nchw, (0, 2, 3, 1))
    lin = jnp.einsum("bhwc,oc->bhwo", x_nhwc, weight) + bias
    lin = jnp.transpose(lin, (0, 3, 1, 2))
    return lin * jax.nn.sigmoid(x_nchw)


if __name__ == "__main__":
    key = jax.random.PRNGKey(0)
    kx, kw, kb = jax.random.split(key, 3)

    B, C, H, W = 2, 4, 16, 16          # in_dim = C = 4
    x = jax.random.normal(kx, (B, C, H, W), dtype=jnp.float32)
    # deterministic synthetic parameters (nn.Linear(in_dim, in_dim) shapes)
    weight = jax.random.normal(kw, (C, C), dtype=jnp.float32) * 0.5
    bias = jax.random.normal(kb, (C,), dtype=jnp.float32) * 0.1

    out = jax.block_until_ready(glu_forward(x, weight, bias))
    ref = jax.block_until_ready(glu_reference(x, weight, bias))

    assert out.shape == (B, C, H, W)
    assert jnp.allclose(out, ref, atol=1e-5, rtol=1e-5)
    print("KERNEL_OK")
</pallas_src>

<mosaic_0001>
module attributes {stable_mosaic.version = 11 : i64} {
  func.func @_glu_kernel(%arg0: i32, %arg1: i32, %arg2: memref<1x4x256xf32, #tpu.memory_space<vmem>>, %arg3: memref<4x4xf32, #tpu.memory_space<vmem>>, %arg4: memref<4x1xf32, #tpu.memory_space<vmem>>, %arg5: memref<1x4x256xf32, #tpu.memory_space<vmem>>) attributes {dimension_semantics = [#tpu.dimension_semantics<parallel>, #tpu.dimension_semantics<parallel>], iteration_bounds = array<i64: 2, 1>, scalar_prefetch = 0 : i64, scratch_operands = 0 : i64, tpu.core_type = #tpu.core_type<tc>, window_params = [{transform_indices = @transform_0, window_bounds = array<i64: 1, 4, 256>}, {pipeline_mode = #tpu.pipeline_mode<synchronous>, transform_indices = @transform_1, window_bounds = array<i64: 4, 4>}, {pipeline_mode = #tpu.pipeline_mode<synchronous>, transform_indices = @transform_2, window_bounds = array<i64: 4, 1>}, {transform_indices = @transform_3, window_bounds = array<i64: 1, 4, 256>}]} {
    %c0 = arith.constant 0 : index
    %c0_0 = arith.constant 0 : index
    %0 = vector.load %arg4[%c0, %c0_0] : memref<4x1xf32, #tpu.memory_space<vmem>>, vector<4x1xf32>
    %c0_1 = arith.constant 0 : index
    %c0_2 = arith.constant 0 : index
    %1 = vector.load %arg3[%c0_1, %c0_2] : memref<4x4xf32, #tpu.memory_space<vmem>>, vector<4x4xf32>
    %c0_3 = arith.constant 0 : index
    %c0_4 = arith.constant 0 : index
    %c0_5 = arith.constant 0 : index
    %2 = vector.load %arg2[%c0_3, %c0_4, %c0_5] : memref<1x4x256xf32, #tpu.memory_space<vmem>>, vector<1x4x256xf32>
    %3 = vector.shape_cast %0 : vector<4x1xf32> to vector<1x4x1xf32>
    %4 = vector.shape_cast %3 : vector<1x4x1xf32> to vector<1x4x1xf32>
    %5 = vector.broadcast %4 : vector<1x4x1xf32> to vector<1x4x256xf32>
    %6 = vector.extract_strided_slice %1 {offsets = [0, 0], sizes = [4, 1], strides = [1, 1]} : vector<4x4xf32> to vector<4x1xf32>
    %7 = vector.shape_cast %6 : vector<4x1xf32> to vector<1x4x1xf32>
    %8 = vector.extract_strided_slice %2 {offsets = [0, 0, 0], sizes = [1, 1, 256], strides = [1, 1, 1]} : vector<1x4x256xf32> to vector<1x1x256xf32>
    %9 = vector.broadcast %7 : vector<1x4x1xf32> to vector<1x4x256xf32>
    %10 = vector.broadcast %8 : vector<1x1x256xf32> to vector<1x4x256xf32>
    %11 = arith.mulf %9, %10 : vector<1x4x256xf32>
    %12 = arith.addf %5, %11 : vector<1x4x256xf32>
    %13 = vector.extract_strided_slice %1 {offsets = [0, 1], sizes = [4, 1], strides = [1, 1]} : vector<4x4xf32> to vector<4x1xf32>
    %14 = vector.shape_cast %13 : vector<4x1xf32> to vector<1x4x1xf32>
    %15 = vector.extract_strided_slice %2 {offsets = [0, 1, 0], sizes = [1, 1, 256], strides = [1, 1, 1]} : vector<1x4x256xf32> to vector<1x1x256xf32>
    %16 = vector.broadcast %14 : vector<1x4x1xf32> to vector<1x4x256xf32>
    %17 = vector.broadcast %15 : vector<1x1x256xf32> to vector<1x4x256xf32>
    %18 = arith.mulf %16, %17 : vector<1x4x256xf32>
    %19 = arith.addf %12, %18 : vector<1x4x256xf32>
    %20 = vector.extract_strided_slice %1 {offsets = [0, 2], sizes = [4, 1], strides = [1, 1]} : vector<4x4xf32> to vector<4x1xf32>
    %21 = vector.shape_cast %20 : vector<4x1xf32> to vector<1x4x1xf32>
    %22 = vector.extract_strided_slice %2 {offsets = [0, 2, 0], sizes = [1, 1, 256], strides = [1, 1, 1]} : vector<1x4x256xf32> to vector<1x1x256xf32>
    %23 = vector.broadcast %21 : vector<1x4x1xf32> to vector<1x4x256xf32>
    %24 = vector.broadcast %22 : vector<1x1x256xf32> to vector<1x4x256xf32>
    %25 = arith.mulf %23, %24 : vector<1x4x256xf32>
    %26 = arith.addf %19, %25 : vector<1x4x256xf32>
    %27 = vector.extract_strided_slice %1 {offsets = [0, 3], sizes = [4, 1], strides = [1, 1]} : vector<4x4xf32> to vector<4x1xf32>
    %28 = vector.shape_cast %27 : vector<4x1xf32> to vector<1x4x1xf32>
    %29 = vector.extract_strided_slice %2 {offsets = [0, 3, 0], sizes = [1, 1, 256], strides = [1, 1, 1]} : vector<1x4x256xf32> to vector<1x1x256xf32>
    %30 = vector.broadcast %28 : vector<1x4x1xf32> to vector<1x4x256xf32>
    %31 = vector.broadcast %29 : vector<1x1x256xf32> to vector<1x4x256xf32>
    %32 = arith.mulf %30, %31 : vector<1x4x256xf32>
    %33 = arith.addf %26, %32 : vector<1x4x256xf32>
    %34 = arith.negf %2 : vector<1x4x256xf32>
    %35 = math.exp %34 : vector<1x4x256xf32>
    %cst = arith.constant 1.000000e+00 : f32
    %36 = vector.broadcast %cst : f32 to vector<1x4x256xf32>
    %37 = arith.addf %36, %35 : vector<1x4x256xf32>
    %38 = arith.divf %36, %37 : vector<1x4x256xf32>
    %39 = arith.mulf %33, %38 : vector<1x4x256xf32>
    %c0_6 = arith.constant 0 : index
    %c0_7 = arith.constant 0 : index
    %c0_8 = arith.constant 0 : index
    %40 = vector.load %arg5[%c0_6, %c0_7, %c0_8] : memref<1x4x256xf32, #tpu.memory_space<vmem>>, vector<1x4x256xf32>
    tpu.vector_store %arg5[%c0_6, %c0_7, %c0_8], %39 {strides = array<i32>} : memref<1x4x256xf32, #tpu.memory_space<vmem>>, vector<1x4x256xf32>,
    return
  }
  func.func @transform_0(%arg0: i32, %arg1: i32) -> (i32, i32, i32) {
    %c0_i32 = arith.constant 0 : i32
    %c0_i32_0 = arith.constant 0 : i32
    return %arg0, %c0_i32, %arg1 : i32, i32, i32
  }
  func.func @transform_1(%arg0: i32, %arg1: i32) -> (i32, i32) {
    %c0_i32 = arith.constant 0 : i32
    %c0_i32_0 = arith.constant 0 : i32
    %c0_i32_1 = arith.constant 0 : i32
    return %c0_i32, %c0_i32_0 : i32, i32
  }
  func.func @transform_2(%arg0: i32, %arg1: i32) -> (i32, i32) {
    %c0_i32 = arith.constant 0 : i32
    %c0_i32_0 = arith.constant 0 : i32
    %c0_i32_1 = arith.constant 0 : i32
    return %c0_i32, %c0_i32_0 : i32, i32
  }
  func.func @transform_3(%arg0: i32, %arg1: i32) -> (i32, i32, i32) {
    %c0_i32 = arith.constant 0 : i32
    %c0_i32_0 = arith.constant 0 : i32
    return %arg0, %c0_i32, %arg1 : i32, i32, i32
  }
}

</mosaic_0001>

<bundles_post_ra>
// kernel: tpu_custom_call.1
= control target key start
LH: loop header
LB: loop body
LE: loop exit
PB: predicated region body
PF: predicated region fallthrough
CT: control target
= control target key end

     0   :  { %8 = vsyncpa [#allocation3], 0  ;;  %s852_s0 = inlined_call_operand.hbm [shape: f32[2,4,256], index: 0, kind: input, shape index: {}]   ;;  %s853_s1 = inlined_call_operand.vmem [shape: f32[4,4], index: 1, kind: input, shape index: {}]   ;;  %s854_s2 = inlined_call_operand.vmem [shape: f32[4,1], index: 2, kind: input, shape index: {}]   ;;  %s855_s3 = inlined_call_operand.hbm [shape: f32[2,4,256], index: 3, kind: output, shape index: {}]  }
   0x1   :  { %10 = vsyncpa [#allocation3 + $0x1], 0 }
   0x2   :  { %11 = vsyncpa [#allocation4], 0 }
   0x3   :  { %13 = vsyncpa [#allocation4 + $0x1], 0  ;;  %s670_s12 = smov 0   ;;  %s672_s13 = smov 0  }
   0x4   :  { %s674_s14 = smov 0   ;;  %s676_s15 = smov 0  }
   0x5   :  { %s678_s16 = smov 0   ;;  %s680_s17 = smov 0  }
   0x6 LB: > { %s438_s18 = sadd.s32 4294967295, %s642_s17   ;;  %s439_s19 = sadd.s32 4294967294, %s642_s17   ;;  %s642_s17 = sphi %s680_s17, %s19_s17   ;;  %s638_s16 = sphi %s678_s16, %s871_s16   ;;  %s634_s15 = sphi %s676_s15, %s870_s15   ;;  %s630_s14 = sphi %s674_s14, %s869_s14   ;;  %s626_s13 = sphi %s672_s13, %s868_s13   ;;  %s622_s12 = sphi %s670_s12, %s867_s12  }
   0x7   : > { %s31_s20 = sadd.s32 1, %s638_s16  ;;  %s40_s21 = sadd.s32 1, %s630_s14 }
   0x8   : > { %p33_p0 = scmp.ge.s32.totalorder %s31_s20, 2  ;;  %p47_p1 = scmp.ne.s32.totalorder %s630_s14, %s626_s13 }
   0x9   : > { %p48_p2 = scmp.eq.s32.totalorder %s642_s17, 0  ;;  %p53_p3 = scmp.ne.s32.totalorder %s626_s13, %s622_s12 }
   0xa   : > { %s873_s20 = smov (%p33_p0, %s31_s20), 0  ;;  %p54_p5 = scmp.eq.s32.totalorder %s438_s18, 0 }
   0xb   : > { %p711_p4 = por %p48_p2, %p47_p1  ;;  %s35_s23 = ssub.s32 %s638_s16, %s873_s20 }
   0xc   : > { %p121_p6 = scmp.eq.s32.totalorder %s438_s18, 1  ;;  %p38_p7 = scmp.eq.s32.totalorder %s35_s23, 0 }
   0xd   : > { %p717_p8 = por %p54_p5, %p53_p3  ;;  %p127_p10 = scmp.eq.s32.totalorder %s439_s19, 1 }
   0xe   : > { %p721_p9 = por %p121_p6, %p47_p1  ;;  %p468_p13 = scmp.lt.s32.totalorder %s642_s17, 2 }
   0xf   : > { %s726_s26 = scalar_select %p38_p7, %s630_s14, %s40_s21  }
  0x10   : > { %s859_s25 = scalar_select %p721_p9, 1, 0 }
  0x11   : > { %p728_p11 = por %p127_p10, %p53_p3  ;;  %s153_s28 = sand.u32 1, %s630_s14  }
  0x12   : > { %s442_s29 = sshll.u32 %s153_s28, 3  ;;  %s454_s30 = sshll.u32 %s638_s16, 7 }
  0x13   : > { %s860_s27 = scalar_select %p728_p11, 1, 0 }
  0x14   : > { %s739_s6 = scalar_lea.hbm %s852_s0, %s454_s30  ;;  %s157_s7 = scalar_lea.vmem [#allocation2], %s442_s29 }
  0x15   : > { %s167_s8 = sshll.u32 %s157_s7, 4  ;;  %p745_p0 = pnand %p468_p13, %p711_p4  ;;  %s741_s8 = int_to_ptr.vmem [resolvable:$true] %s167_s8 }
  0x16   : > { %s154_s10 = scalar_lea.sflag [#allocation3], %s153_s28  ;;  %s530_s11 = scalar_lea.hbm %s739_s6, 128 }
  0x17   : > { %p531_p3 = scmp.ne.s32.totalorder %s739_s6, %s530_s11  ;;  %p532_p5 = pneg %p745_p0 }
  0x18   : > { %s535_s21 = scalar_lea.hbm %s852_s0, 256  ;;  %p536_p4 = scmp.lt.u32.totalorder %s739_s6, %s852_s0 }
  0x19   : > { %p533_p6 = pnand %p532_p5, %p531_p3  ;;  %p537_p10 = scmp.lt.u32.totalorder %s535_s21, %s530_s11 }
  0x1a   : > { %p539_p12 = scmp.lt.u32.totalorder %s530_s11, %s739_s6 }
  0x1b   : > { %p534_p7 = pneg %p533_p6  ;;  %p538_p13 = por %p537_p10, %p536_p4 }
  0x1d   : > { %p540_p1 = por %p539_p12, %p538_p13 }
  0x1f   : > { %p541_p2 = pnand %p540_p1, %p534_p7 }
  0x21   : > { %544 = shalt.err (!%p541_p2)
}
  0x22   : > { %s545_s28 = scalar_lea.vmem %s741_s8, 128  ;;  %s644_s29 = smov [#allocation2]  }
  0x23   : > { %p546_p3 = scmp.ne.s32.totalorder %s741_s8, %s545_s28  ;;  %s550_s30 = sshll.u32 %s644_s29, 4  ;;  %s551_s30 = int_to_ptr.vmem [resolvable:$false] %s550_s30 }
  0x24   : > { %s552_s4 = scalar_lea.vmem %s551_s30, 256  ;;  %p553_p9 = scmp.lt.s32.totalorder %s741_s8, %s551_s30 }
  0x25   : > { %p548_p6 = pnand %p546_p3, %p532_p5  ;;  %p554_p4 = scmp.lt.s32.totalorder %s552_s4, %s545_s28 }
  0x27   : > { %p549_p11 = pneg %p548_p6  ;;  %p555_p10 = por %p554_p4, %p553_p9 }
  0x29   : > { %p556_p12 = pnand %p555_p10, %p549_p11 }
  0x2b   : > { %559 = shalt.err (!%p556_p12)
}
  0x2c   : > { %463 = dma.hbm_to_vmem [thread:$0]  (!%p745_p0), %s739_s6, 128, %s741_s8, %s154_s10  }
  0x2d   : > { %p862_p1 = scmp.lt.s32.totalorder %s642_s17, 3  ;;  %p863_p2 = scmp.ge.s32.totalorder %s642_s17, 1 }
  0x2f   : > { %p173_p5 = pnand %p863_p2, %p862_p1 }
  0x30   : > { %s781_s5 = sand.u32 (!%p173_p5), 1, %s626_s13  }
  0x31   : > { %176 = sbr.rel (%p173_p5) target bundleno = 218 (0xda), region = 32  ;;  %s446_s7 = sshll.u32 (!%p173_p5), %s781_s5, 3 }
  0x32   : > { %s179_s11 = scalar_lea.sflag (!%p173_p5), [#allocation3], %s781_s5  ;;  %s182_s9 = scalar_lea.vmem (!%p173_p5), [#allocation2], %s446_s7 }
  0x38   : > { %613 = dma.done.wait (%p717_p8), %s179_s11, 128  }
  0x39   : > { %615 = vsyncadd (%p717_p8), %s179_s11, 4294967168  ;;  %v645_v0 = vmov 0   ;;  %v646_v1 = vmov 1   ;;  %v208_v2 = vld [vmem:[%s853_s1] sm:$0xf]  ;;  %v647_v4 = vmov 2   ;;  %v221_v8 = vlaneseq }
  0x3a   : > { %522 = vset.pattern.permute.xlu0 %v645_v0  ;;  %523 = vset.pattern.permute.xlu1 %v646_v1  ;;  %v207_v3 = vld [vmem:[%s854_s2] sm:$0xf]  ;;  %v648_v5 = vmov 3   ;;  %s455_s24 = sshll.u32 %s634_s15, 7  ;;  %s204_s19 = scalar_lea.vmem [#allocation5], %s446_s7 }
  0x3b   : > { %217 = vperm.xlu0 %522, %v208_v2   ;;  %244 = vperm.xlu1 %523, %v208_v2   ;;  %v209_v6 = vld [vmem:[%s182_s9] sm:$0xff]  ;;  %v222_v9 = vshrl.u32 %v221_v8, 7  ;;  %s354_s21 = sshll.u32 %s204_s19, 4  ;;  %s803_s28 = scalar_lea.hbm %s855_s3, %s455_s24  ;;  %s805_s21 = int_to_ptr.vmem [resolvable:$true] %s354_s21 }
  0x3c   : > { %v448_v7 = vmul.f32 -1.442695, %v209_v6  ;;  %s338_s29 = scalar_lea.sflag [#allocation4], %s781_s5  ;;  %s560_s30 = scalar_lea.vmem %s805_s21, 128 }
  0x3d   : > { %v223_v11 = vsub.s32 0, %v222_v9  ;;  %v227_v12 = vsub.s32 4, %v222_v9  ;;  %v249_v13 = vsub.s32 1, %v222_v9  ;;  %v253_v14 = vsub.s32 5, %v222_v9  ;;  %p561_p8 = scmp.ne.s32.totalorder %s805_s21, %s560_s30  ;;  %p864_p9 = scmp.ne.s32.totalorder %s859_s25, 0 }
  0x3e   : > { %526 = vpow2.f32 %v448_v7  ;;  %v275_v16 = vsub.s32 2, %v222_v9  ;;  %v279_v17 = vsub.s32 6, %v222_v9  ;;  %v301_v24 = vsub.s32 3, %v222_v9  ;;  %s649_s15 = smov [#allocation5]  }
  0x3f   : > { %212 = vperm.xlu0 %522, %v207_v3   ;;  %524 = vset.pattern.permute.xlu1 %v647_v4  ;;  %v224_v18 = vrot.slane %v209_v6, %v223_v11  ;;  %v228_v19 = vrot.slane %v209_v6, %v227_v12  ;;  %v250_v20 = vrot.slane %v209_v6, %v249_v13  ;;  %v305_v25 = vsub.s32 7, %v222_v9  ;;  %p562_p11 = pnand %p561_p8, %p864_p9  ;;  %s564_s4 = sshll.u32 %s649_s15, 4  ;;  %s565_s4 = int_to_ptr.vmem [resolvable:$false] %s564_s4 }
  0x40   : > { %270 = vperm.xlu1 %524, %v208_v2   ;;  %v254_v21 = vrot.slane %v209_v6, %v253_v14  ;;  %v276_v22 = vrot.slane %v209_v6, %v275_v16  ;;  %v280_v23 = vrot.slane %v209_v6, %v279_v17  ;;  %v302_v34 = vrot.slane %v209_v6, %v301_v24  ;;  %s566_s7 = scalar_lea.vmem %s565_s4, 256  ;;  %p567_p7 = scmp.lt.s32.totalorder %s805_s21, %s565_s4 }
  0x41   : > { %v234_v26 = vrot.slane %v224_v18, %v223_v11  ;;  %v238_v27 = vrot.slane %v228_v19, %v223_v11  ;;  %v260_v30 = vrot.slane %v250_v20, %v249_v13  ;;  %v306_v35 = vrot.slane %v209_v6, %v305_v25  ;;  %p563_p0 = pneg %p562_p11  ;;  %p568_p13 = scmp.lt.s32.totalorder %s566_s7, %s560_s30 }
  0x42   : > { %v264_v31 = vrot.slane %v254_v21, %v249_v13  ;;  %v286_v32 = vrot.slane %v276_v22, %v275_v16  ;;  %v290_v33 = vrot.slane %v280_v23, %v275_v16  ;;  %v312_v46 = vrot.slane %v302_v34, %v301_v24 }
  0x43   : > { %525 = vset.pattern.permute.xlu0 %v648_v5  ;;  %v316_v47 = vrot.slane %v306_v35, %v301_v24  ;;  %p569_p3 = por %p568_p13, %p567_p7 }
  0x44   : > { %296 = vperm.xlu0 %525, %v208_v2  }
  0x45   : > { %p570_p6 = pnand %p569_p3, %p563_p0 }
  0x48   : > { %v527_v10 = vpop.eup %526 }
  0x49   : > { %v324_v15 = vadd.f32 1.0, %v527_v10 }
  0x4b   : > { %528 = vrcp.f32 %v324_v15 }
  0x55   : > { %v529_v48 = vpop.eup %528 }
  0x56   : > { %v328_v54 = vcombine.high %v529_v48, %v529_v48 }
  0xba   : > { %v218_v28 = vpop.permute.xlu0 %217  ;;  %v245_v29 = vpop.permute.xlu1 %244 }
  0xbb   : > { %v239_v36 = vmul.f32 %v234_v26, %v218_v28  ;;  %v240_v37 = vmul.f32 %v238_v27, %v218_v28  ;;  %v265_v39 = vmul.f32 %v260_v30, %v245_v29  ;;  %v266_v40 = vmul.f32 %v264_v31, %v245_v29 }
  0xbe   : > { %v213_v38 = vpop.permute.xlu0 %212 }
  0xbf   : > { %v241_v41 = vadd.f32 %v239_v36, %v213_v38  ;;  %v242_v42 = vadd.f32 %v240_v37, %v213_v38  ;;  %v271_v43 = vpop.permute.xlu1 %270 }
  0xc0   : > { %v291_v44 = vmul.f32 %v286_v32, %v271_v43  ;;  %v292_v45 = vmul.f32 %v290_v33, %v271_v43 }
  0xc1   : > { %v267_v49 = vadd.f32 %v265_v39, %v241_v41  ;;  %v268_v50 = vadd.f32 %v266_v40, %v242_v42 }
  0xc3   : > { %v293_v51 = vadd.f32 %v291_v44, %v267_v49  ;;  %v294_v52 = vadd.f32 %v292_v45, %v268_v50  ;;  %v297_v53 = vpop.permute.xlu0 %296 }
  0xc4   : > { %v317_v55 = vmul.f32 %v312_v46, %v297_v53  ;;  %v318_v56 = vmul.f32 %v316_v47, %v297_v53 }
  0xc6   : > { %v319_v57 = vadd.f32 %v317_v55, %v293_v51  ;;  %v320_v58 = vadd.f32 %v318_v56, %v294_v52 }
  0xc8   : > { %v330_v59 = vmul.f32 %v529_v48, %v319_v57  ;;  %v331_v60 = vmul.f32 %v328_v54, %v320_v58 }
  0xca   : > { %v334_v61 = vcombine.low %v330_v59, %v331_v60 }
  0xcc   : > { %336 = vst [vmem:[%s204_s19] sm:$0xff] %v334_v61 }
  0xcd   : > { %573 = shalt.err (!%p570_p6)
}
  0xce   : > { %s574_s5 = scalar_lea.hbm %s803_s28, 128  ;;  %s578_s6 = scalar_lea.hbm %s855_s3, 256 }
  0xcf   : > { %p575_p4 = scmp.ne.s32.totalorder %s803_s28, %s574_s5  ;;  %p579_p1 = scmp.lt.u32.totalorder %s803_s28, %s855_s3 }
  0xd0   : > { %p580_p2 = scmp.lt.u32.totalorder %s578_s6, %s574_s5  ;;  %p582_p8 = scmp.lt.u32.totalorder %s574_s5, %s803_s28 }
  0xd1   : > { %p576_p10 = pnand %p575_p4, %p864_p9 }
  0xd2   : > { %p581_p5 = por %p580_p2, %p579_p1 }
  0xd3   : > { %p577_p12 = pneg %p576_p10 }
  0xd4   : > { %p583_p11 = por %p582_p8, %p581_p5 }
  0xd6   : > { %p584_p0 = pnand %p583_p11, %p577_p12 }
  0xd8   : > { %587 = shalt.err (!%p584_p0)
}
  0xd9   : > { %458 = dma.vmem_to_hbm [thread:$0]  (%p864_p9), %s805_s21, 128, %s803_s28, %s338_s29  }
  0xda PF: > { %s366_s18 = sand.u32 1, %s622_s12   ;;  %p865_p7 = scmp.ne.s32.totalorder %s860_s27, 0 }
  0xdb   : > { %p866_p13 = scmp.ge.s32.totalorder %s642_s17, 2  ;;  %s367_s24 = scalar_lea.sflag [#allocation4], %s366_s18 }
  0xdd   : > { %p465_p3 = pnand %p866_p13, %p865_p7 }
  0xdf   : > { %617 = dma.done.wait (!%p465_p3), %s367_s24, 128  }
  0xe0   : > { %619 = vsyncadd (!%p465_p3), %s367_s24, 4294967168  ;;  %s19_s17 = sadd.s32 1, %s642_s17   ;;  %s867_s12 = smov %s626_s13 }
  0xe1   : > { %p16_p6 = scmp.ge.s32.totalorder %s19_s17, 4   ;;  %s868_s13 = smov %s630_s14 }
  0xe2   : > { %s869_s14 = smov %s726_s26  ;;  %s870_s15 = smov %s638_s16 }
  0xe3   : > { %s871_s16 = smov %s873_s20  ;;  %18 = sbr.rel (!%p16_p6) target bundleno = 6 (0x6), region = 77 }
  0xea   :  { %372 = vsyncpa [#allocation3], 1 }
  0xeb   :  { %374 = vsyncpa [#allocation3 + $0x1], 1 }
  0xec   :  { %375 = vsyncpa [#allocation4], 1 }
  0xed   :  { %377 = vsyncpa [#allocation4 + $0x1], 1 }

</bundles_post_ra>
